<compile_context>
chip_gen: v7x
topology: tpu7x:2x2x1
jax: 0.10.0
libtpu: 0.0.40
codegen_flags: <defaults>
</compile_context>

<pallas_src>
import functools

import jax
import jax.numpy as jnp
from jax.experimental import pallas as pl
from jax.experimental.pallas import tpu as pltpu


def _se_attention_kernel(x_ref, w1t_ref, w2t_ref, out_ref, y_ref, *, inv_hw):
    """One grid step = Bt samples: avg-pool, 2-layer gate MLP, channel rescale."""
    x = x_ref[...]                                          # (Bt, C, HW_pad), native dtype

    # AdaptiveAvgPool2d(1): f32-accumulated mean over the *true* HW (pad lanes are 0).
    pooled = jnp.sum(x, axis=-1, dtype=jnp.float32) * inv_hw           # (Bt, C)

    # fc: Linear(C -> C//ratio, no bias) -> ReLU -> Linear(-> C, no bias) -> Sigmoid.
    # Weights were pre-transposed in the wrapper, so no .T in the hot path.
    h = jnp.maximum(
        jnp.dot(pooled, w1t_ref[...], preferred_element_type=jnp.float32), 0.0)
    y = jax.nn.sigmoid(
        jnp.dot(h, w2t_ref[...], preferred_element_type=jnp.float32))  # (Bt, C)

    # Lane-dense gate output (C on lanes); reshaped to (B, C) in the wrapper.
    y_ref[...] = y[:, None, :]

    # Single gate broadcast; rescale in the streamed dtype (no f32 store-through).
    gate = y.astype(x.dtype)[:, :, None]                    # (Bt, C, 1)
    out_ref[...] = (x * gate).astype(out_ref.dtype)


@functools.partial(jax.jit, static_argnames=("op_channel",))
def _group_stats(y, op_channel):
    """Per-group sum - unbiased std of the (B, C) gates, all on device."""
    b = y.shape[0]
    yg = y[:, :3 * op_channel].reshape(b, 3, op_channel)
    s = jnp.sum(yg, axis=(0, 2))                            # (3,)
    std = jnp.std(yg, axis=(0, 2), ddof=1)                  # torch.std is unbiased
    return s - std


def attention_module_up(x, w1, w2):
    b, c, hh, ww = x.shape
    hidden = w1.shape[0]
    hw = hh * ww
    hw_pad = ((hw + 127) // 128) * 128                      # lane-dense last dim

    x3 = x.reshape(b, c, hw)
    if hw_pad != hw:
        x3 = jnp.pad(x3, ((0, 0), (0, 0), (0, hw_pad - hw)))

    # Pre-transpose weights once (PyTorch Linear weights are (out, in)).
    w1t = w1.astype(jnp.float32).T                          # (C, hidden)
    w2t = w2.astype(jnp.float32).T                          # (hidden, C)

    itemsize = x3.dtype.itemsize
    per_sample_bytes = c * hw_pad * itemsize

    # Generation-aware VMEM budget: 64 MiB physical on v7x -> ~48 MiB usable,
    # 128 MiB on v5e/v6e -> ~96 MiB usable.
    try:
        vmem_cap = int(getattr(pltpu.get_tpu_info(), "vmem_capacity_bytes"))
    except Exception:
        vmem_cap = 64 * 1024 * 1024
    budget = (vmem_cap * 3) // 4

    # Samples per grid step: biggest tile that (a) keeps >= 2 grid steps for
    # megacore sharding and (b) fits double-buffered x+out tiles in the budget.
    fixed_bytes = 8 * c * hidden + (1 << 20)                # weights + slack
    bt_vmem = max(1, (budget - fixed_bytes) // (4 * per_sample_bytes))
    min_steps = 2 if b > 1 else 1
    bt_steps = max(1, -(-b // min_steps))                   # ceil(b / min_steps)
    bt = max(1, min(bt_vmem, bt_steps, b))
    # TODO(synk): if a single (C, HW) sample slab exceeds the per-step VMEM budget,
    # switch to a two-pass structure (HW-chunked pooled-sum reduction with pl.when
    # init/finalize, then a lane-dense rescale pass with y resident/prefetched).

    steps = -(-b // bt)                                     # ceil(b / bt)
    b_pad = steps * bt
    if b_pad != b:
        x3 = jnp.pad(x3, ((0, b_pad - b), (0, 0), (0, 0)))

    vmem_limit = int(min(max(4 * bt * per_sample_bytes + fixed_bytes, 8 << 20),
                         budget))

    cost = pl.CostEstimate(
        flops=b_pad * c * hw + 4 * b_pad * c * hidden,
        transcendentals=b_pad * c,
        bytes_accessed=2 * b_pad * c * hw_pad * itemsize + b_pad * c * 4
        + 2 * c * hidden * 4,
    )

    kernel = functools.partial(_se_attention_kernel, inv_hw=1.0 / hw)

    out3, y3 = pl.pallas_call(
        kernel,
        grid=(steps,),
        in_specs=[
            pl.BlockSpec((bt, c, hw_pad), lambda i: (i, 0, 0)),  # x: Bt samples
            pl.BlockSpec((c, hidden), lambda i: (0, 0)),         # w1.T (resident)
            pl.BlockSpec((hidden, c), lambda i: (0, 0)),         # w2.T (resident)
        ],
        out_specs=(
            pl.BlockSpec((bt, c, hw_pad), lambda i: (i, 0, 0)),  # attention_out
            pl.BlockSpec((bt, 1, c), lambda i: (i, 0, 0)),       # gates, lane-dense
        ),
        out_shape=(
            jax.ShapeDtypeStruct((b_pad, c, hw_pad), x3.dtype),
            jax.ShapeDtypeStruct((b_pad, 1, c), jnp.float32),
        ),
        compiler_params=pltpu.CompilerParams(
            dimension_semantics=("parallel",),
            vmem_limit_bytes=vmem_limit,
        ),
        cost_estimate=cost,
    )(x3, w1t, w2t)

    out3 = out3[:b, :, :hw]
    attention_out = out3.reshape(b, c, hh, ww)
    y = y3[:b, 0, :]                                        # (B, C) channel gates

    # Glue: per-group scalar stats; one device->host transfer for all three.
    op_channel = c // 3
    stats = jax.device_get(_group_stats(y, op_channel))
    op_attention = [float(v) for v in stats]
    return attention_out, op_attention


def _reference(x, w1, w2):
    """Pure-JAX reference for a correctness sanity check."""
    b, c, hh, ww = x.shape
    xf = x.astype(jnp.float32)
    pooled = jnp.mean(xf.reshape(b, c, hh * ww), axis=-1)
    h = jnp.maximum(pooled @ w1.T, 0.0)
    y = jax.nn.sigmoid(h @ w2.T)
    out = xf * y[:, :, None, None]
    op_channel = c // 3
    ops = []
    for i in range(3):
        temp = y[:, i * op_channel:(i + 1) * op_channel]
        ops.append(float(jnp.sum(temp) - jnp.std(temp, ddof=1)))
    return out, ops


if __name__ == "__main__":
    # channel=48 (divisible by 3 and by ratio=16 -> hidden=3, op_channel=16),
    # H=W=16 so HW=256 is lane-dense (multiple of 128). B=4 -> Bt=2, 2 grid steps.
    B, C, H, W = 4, 48, 16, 16
    RATIO = 16
    HIDDEN = C // RATIO

    key = jax.random.PRNGKey(0)
    kx, k1, k2 = jax.random.split(key, 3)
    x = jax.random.normal(kx, (B, C, H, W), dtype=jnp.float32)
    # Deterministic synthetic weights (PyTorch Linear weight shapes: (out, in)).
    w1 = 0.1 * jax.random.normal(k1, (HIDDEN, C), dtype=jnp.float32)
    w2 = 0.1 * jax.random.normal(k2, (C, HIDDEN), dtype=jnp.float32)

    # f32 run: tight check against the pure-JAX reference.
    attention_out, op_attention = attention_module_up(x, w1, w2)
    attention_out = jax.block_until_ready(attention_out)
    ref_out, ref_ops = _reference(x, w1, w2)
    assert attention_out.shape == (B, C, H, W)
    assert jnp.allclose(attention_out, ref_out, atol=1e-5, rtol=1e-5)
    assert len(op_attention) == 3
    for a, r in zip(op_attention, ref_ops):
        assert abs(a - r) < 1e-3

    # bf16 streaming run (halves HBM traffic on this mem-bound op): looser check
    # against a reference fed the same bf16-rounded input.
    x_bf16 = x.astype(jnp.bfloat16)
    out_bf16, ops_bf16 = attention_module_up(x_bf16, w1, w2)
    out_bf16 = jax.block_until_ready(out_bf16)
    ref_bf16, ref_ops_bf16 = _reference(x_bf16, w1, w2)
    assert out_bf16.dtype == jnp.bfloat16
    assert jnp.allclose(out_bf16.astype(jnp.float32), ref_bf16,
                        atol=3e-2, rtol=3e-2)
    for a, r in zip(ops_bf16, ref_ops_bf16):
        assert abs(a - r) < 1e-2

    print("KERNEL_OK")
</pallas_src>

<mosaic_0001>
module attributes {stable_mosaic.version = 11 : i64} {
  func.func @_se_attention_kernel(%arg0: i32, %arg1: memref<2x48x256xf32, #tpu.memory_space<vmem>>, %arg2: memref<48x3xf32, #tpu.memory_space<vmem>>, %arg3: memref<3x48xf32, #tpu.memory_space<vmem>>, %arg4: memref<2x48x256xf32, #tpu.memory_space<vmem>>, %arg5: memref<2x1x48xf32, #tpu.memory_space<vmem>>) attributes {dimension_semantics = [#tpu.dimension_semantics<parallel>], iteration_bounds = array<i64: 2>, scalar_prefetch = 0 : i64, scratch_operands = 0 : i64, tpu.core_type = #tpu.core_type<tc>, window_params = [{transform_indices = @transform_0, window_bounds = array<i64: 2, 48, 256>}, {pipeline_mode = #tpu.pipeline_mode<synchronous>, transform_indices = @transform_1, window_bounds = array<i64: 48, 3>}, {pipeline_mode = #tpu.pipeline_mode<synchronous>, transform_indices = @transform_2, window_bounds = array<i64: 3, 48>}, {transform_indices = @transform_3, window_bounds = array<i64: 2, 48, 256>}, {transform_indices = @transform_4, window_bounds = array<i64: 2, 1, 48>}]} {
    %c0 = arith.constant 0 : index
    %c0_0 = arith.constant 0 : index
    %c0_1 = arith.constant 0 : index
    %0 = vector.load %arg1[%c0, %c0_0, %c0_1] : memref<2x48x256xf32, #tpu.memory_space<vmem>>, vector<2x48x256xf32>
    %cst = arith.constant dense<0.000000e+00> : vector<2x48xf32>
    %1 = vector.multi_reduction <add>, %0, %cst [2] : vector<2x48x256xf32> to vector<2x48xf32>
    %cst_2 = arith.constant 3.906250e-03 : f32
    %2 = vector.broadcast %cst_2 : f32 to vector<2x48xf32>
    %3 = arith.mulf %1, %2 : vector<2x48xf32>
    %c0_3 = arith.constant 0 : index
    %c0_4 = arith.constant 0 : index
    %4 = vector.load %arg2[%c0_3, %c0_4] : memref<48x3xf32, #tpu.memory_space<vmem>>, vector<48x3xf32>
    %cst_5 = arith.constant dense<0.000000e+00> : vector<2x3xf32>
    %5 = tpu.matmul %3, %4, %cst_5 {dimension_numbers = #tpu.dot_dimension_numbers<[1], [0], [0], [1], [0, 0, 1, 1], [], []>} : vector<2x48xf32>, vector<48x3xf32>, vector<2x3xf32> -> vector<2x3xf32>
    %cst_6 = arith.constant 0.000000e+00 : f32
    %6 = vector.broadcast %cst_6 : f32 to vector<2x3xf32>
    %7 = arith.maximumf %5, %6 : vector<2x3xf32>
    %c0_7 = arith.constant 0 : index
    %c0_8 = arith.constant 0 : index
    %8 = vector.load %arg3[%c0_7, %c0_8] : memref<3x48xf32, #tpu.memory_space<vmem>>, vector<3x48xf32>
    %cst_9 = arith.constant dense<0.000000e+00> : vector<2x48xf32>
    %9 = tpu.matmul %7, %8, %cst_9 {dimension_numbers = #tpu.dot_dimension_numbers<[1], [0], [0], [1], [0, 0, 1, 1], [], []>} : vector<2x3xf32>, vector<3x48xf32>, vector<2x48xf32> -> vector<2x48xf32>
    %10 = arith.negf %9 : vector<2x48xf32>
    %11 = math.exp %10 : vector<2x48xf32>
    %cst_10 = arith.constant 1.000000e+00 : f32
    %12 = vector.broadcast %cst_10 : f32 to vector<2x48xf32>
    %13 = arith.addf %12, %11 : vector<2x48xf32>
    %14 = arith.divf %12, %13 : vector<2x48xf32>
    %15 = vector.shape_cast %14 : vector<2x48xf32> to vector<2x1x48xf32>
    %c0_11 = arith.constant 0 : index
    %c0_12 = arith.constant 0 : index
    %c0_13 = arith.constant 0 : index
    %16 = vector.load %arg5[%c0_11, %c0_12, %c0_13] : memref<2x1x48xf32, #tpu.memory_space<vmem>>, vector<2x1x48xf32>
    tpu.vector_store %arg5[%c0_11, %c0_12, %c0_13], %15 {strides = array<i32>} : memref<2x1x48xf32, #tpu.memory_space<vmem>>, vector<2x1x48xf32>,
    %17 = vector.shape_cast %14 : vector<2x48xf32> to vector<2x48x1xf32>
    %18 = vector.broadcast %17 : vector<2x48x1xf32> to vector<2x48x256xf32>
    %19 = arith.mulf %0, %18 : vector<2x48x256xf32>
    %c0_14 = arith.constant 0 : index
    %c0_15 = arith.constant 0 : index
    %c0_16 = arith.constant 0 : index
    %20 = vector.load %arg4[%c0_14, %c0_15, %c0_16] : memref<2x48x256xf32, #tpu.memory_space<vmem>>, vector<2x48x256xf32>
    tpu.vector_store %arg4[%c0_14, %c0_15, %c0_16], %19 {strides = array<i32>} : memref<2x48x256xf32, #tpu.memory_space<vmem>>, vector<2x48x256xf32>,
    return
  }
  func.func @transform_0(%arg0: i32) -> (i32, i32, i32) {
    %c0_i32 = arith.constant 0 : i32
    %c0_i32_0 = arith.constant 0 : i32
    %c0_i32_1 = arith.constant 0 : i32
    return %arg0, %c0_i32, %c0_i32_0 : i32, i32, i32
  }
  func.func @transform_1(%arg0: i32) -> (i32, i32) {
    %c0_i32 = arith.constant 0 : i32
    %c0_i32_0 = arith.constant 0 : i32
    %c0_i32_1 = arith.constant 0 : i32
    return %c0_i32, %c0_i32_0 : i32, i32
  }
  func.func @transform_2(%arg0: i32) -> (i32, i32) {
    %c0_i32 = arith.constant 0 : i32
    %c0_i32_0 = arith.constant 0 : i32
    %c0_i32_1 = arith.constant 0 : i32
    return %c0_i32, %c0_i32_0 : i32, i32
  }
  func.func @transform_3(%arg0: i32) -> (i32, i32, i32) {
    %c0_i32 = arith.constant 0 : i32
    %c0_i32_0 = arith.constant 0 : i32
    %c0_i32_1 = arith.constant 0 : i32
    return %arg0, %c0_i32, %c0_i32_0 : i32, i32, i32
  }
  func.func @transform_4(%arg0: i32) -> (i32, i32, i32) {
    %c0_i32 = arith.constant 0 : i32
    %c0_i32_0 = arith.constant 0 : i32
    %c0_i32_1 = arith.constant 0 : i32
    return %arg0, %c0_i32, %c0_i32_0 : i32, i32, i32
  }
}

</mosaic_0001>

<bundles_post_ra>
// kernel: tpu_custom_call.1
= control target key start
LH: loop header
LB: loop body
LE: loop exit
PB: predicated region body
PF: predicated region fallthrough
CT: control target
= control target key end

     0   :  { %10 = vsyncpa [#allocation3], 0  ;;  %s1500_s0 = inlined_call_operand.hbm [shape: f32[4,48,256], index: 0, kind: input, shape index: {}]   ;;  %s1501_s1 = inlined_call_operand.vmem [shape: f32[48,3], index: 1, kind: input, shape index: {}]   ;;  %s1502_s2 = inlined_call_operand.vmem [shape: f32[3,48], index: 2, kind: input, shape index: {}]   ;;  %s1503_s3 = inlined_call_operand.hbm [shape: f32[4,48,256], index: 3, kind: output, shape index: {0}]   ;;  %s1504_s4 = inlined_call_operand.hbm [shape: f32[4,1,48], index: 4, kind: output, shape index: {1}]  }
   0x1   :  { %12 = vsyncpa [#allocation3 + $0x1], 0 }
   0x2   :  { %13 = vsyncpa [#allocation4], 0 }
   0x3   :  { %15 = vsyncpa [#allocation4 + $0x1], 0 }
   0x4   :  { %16 = vsyncpa [#allocation7], 0 }
   0x5   :  { %18 = vsyncpa [#allocation7 + $0x1], 0  ;;  %s1117_s15 = smov 0   ;;  %s1119_s16 = smov 0  }
   0x6   :  { %s1121_s17 = smov 0   ;;  %s1123_s18 = smov 0  }
   0x7 LB: > { %s1138_s19 = sadd.s32 4294967295, %s1078_s18   ;;  %s823_s20 = sadd.s32 4294967294, %s1078_s18   ;;  %s1078_s18 = sphi %s1123_s18, %s1516_s18   ;;  %s1074_s17 = sphi %s1121_s17, %s1515_s17   ;;  %s1070_s16 = sphi %s1119_s16, %s1514_s16   ;;  %s1066_s15 = sphi %s1117_s15, %s1513_s15  }
   0x8   : > { %s1142_s21 = sadd.s32 1, %s1078_s18   ;;  %s31_s22 = sadd.s32 1, %s1074_s17 }
   0x9   : > { %s28_s23 = ssub.s32 %s1078_s18, %s1142_s21  ;;  %p38_p0 = scmp.ne.s32.totalorder %s1074_s17, %s1070_s16 }
   0xa   : > { %p29_p1 = scmp.eq.s32.totalorder %s28_s23, 0  ;;  %p39_p2 = scmp.eq.s32.totalorder %s1078_s18, 0 }
   0xb   : > { %p44_p3 = scmp.ne.s32.totalorder %s1070_s16, %s1066_s15  ;;  %p45_p4 = scmp.eq.s32.totalorder %s1138_s19, 0 }
   0xc   : > { %s1154_s24 = scalar_select %p29_p1, %s1074_s17, %s31_s22  }
   0xd   : > { %p40_p5 = por %p39_p2, %p38_p0  ;;  %p1156_p6 = por %p45_p4, %p44_p3 }
   0xe   : > { %p110_p7 = scmp.eq.s32.totalorder %s1138_s19, 1  ;;  %p116_p8 = scmp.eq.s32.totalorder %s823_s20, 1 }
   0xf   : > { %p903_p10 = scmp.lt.s32.totalorder %s1078_s18, 2  ;;  %s168_s28 = sand.u32 1, %s1074_s17  }
  0x10   : > { %p1163_p11 = por %p110_p7, %p38_p0  ;;  %p1167_p12 = por %p116_p8, %p44_p3 }
  0x11   : > { %s883_s29 = smul.u32 3072, %s1078_s18  ;;  %p1178_p13 = pnand %p903_p10, %p40_p5 }
  0x12   : > { %s1507_s26 = scalar_select %p1163_p11, 1, 0 }
  0x13   : > { %s1508_s27 = scalar_select %p1167_p12, 1, 0 }
  0x14   : > { %s882_s30 = smul.u32 192, %s168_s28  ;;  %s1176_s7 = scalar_lea.hbm %s1500_s0, %s883_s29 }
  0x15   : > { %s1184_s11 = scalar_lea.sflag [#allocation3], %s168_s28  ;;  %s950_s12 = scalar_lea.hbm %s1176_s7, 3072 }
  0x16   : > { %s172_s9 = scalar_lea.vmem [#allocation2], %s882_s30  ;;  %p951_p0 = scmp.ne.s32.totalorder %s1176_s7, %s950_s12 }
  0x17   : > { %s180_s10 = sshll.u32 %s172_s9, 4  ;;  %p952_p1 = pneg %p1178_p13  ;;  %s1182_s10 = int_to_ptr.vmem [resolvable:$true] %s180_s10 }
  0x18   : > { %s955_s20 = scalar_lea.hbm %s1500_s0, 6144  ;;  %p956_p4 = scmp.lt.u32.totalorder %s1176_s7, %s1500_s0 }
  0x19   : > { %p953_p2 = pnand %p952_p1, %p951_p0  ;;  %p957_p5 = scmp.lt.u32.totalorder %s955_s20, %s950_s12 }
  0x1a   : > { %p959_p8 = scmp.lt.u32.totalorder %s950_s12, %s1176_s7 }
  0x1b   : > { %p954_p3 = pneg %p953_p2  ;;  %p958_p7 = por %p957_p5, %p956_p4 }
  0x1d   : > { %p960_p10 = por %p959_p8, %p958_p7 }
  0x1f   : > { %p961_p9 = pnand %p960_p10, %p954_p3 }
  0x21   : > { %964 = shalt.err (!%p961_p9)
}
  0x22   : > { %s965_s28 = scalar_lea.vmem %s1182_s10, 3072  ;;  %s1080_s29 = smov [#allocation2]  }
  0x23   : > { %p966_p0 = scmp.ne.s32.totalorder %s1182_s10, %s965_s28  ;;  %s970_s30 = sshll.u32 %s1080_s29, 4  ;;  %s971_s30 = int_to_ptr.vmem [resolvable:$false] %s970_s30 }
  0x24   : > { %s972_s5 = scalar_lea.vmem %s971_s30, 6144  ;;  %p973_p11 = scmp.lt.s32.totalorder %s1182_s10, %s971_s30 }
  0x25   : > { %p968_p2 = pnand %p966_p0, %p952_p1  ;;  %p974_p4 = scmp.lt.s32.totalorder %s972_s5, %s965_s28 }
  0x27   : > { %p969_p12 = pneg %p968_p2  ;;  %p975_p5 = por %p974_p4, %p973_p11 }
  0x29   : > { %p976_p7 = pnand %p975_p5, %p969_p12 }
  0x2b   : > { %979 = shalt.err (!%p976_p7)
}
  0x2c   : > { %s1081_s6 = smov 256   ;;  %s1082_s9 = smov 16  }
  0x2d   : > { %895 = dma.hbm_to_vmem [thread:$0]  (!%p1178_p13), %s1176_s7, 3072, %s1182_s10, %s1184_s11, %s1081_s6, %s1081_s6, %s1082_s9  }
  0x2e   : > { %p829_p9 = scmp.ge.s32.totalorder %s1078_s18, 1  ;;  %p188_p1 = scmp.lt.s32.totalorder %s1078_s18, 3 }
  0x30   : > { %p189_p3 = pnand %p829_p9, %p188_p1 }
  0x31   : > { %s1215_s12 = sand.u32 (!%p189_p3), 1, %s1070_s16  }
  0x32   : > { %192 = sbr.rel (%p189_p3) target bundleno = 849 (0x351), region = 32  ;;  %s195_s14 = scalar_lea.sflag (!%p189_p3), [#allocation3], %s1215_s12 }
  0x33   : > { %s884_s13 = smul.u32 (!%p189_p3), 192, %s1215_s12 }
  0x35   : > { %s1221_s20 = scalar_lea.vmem (!%p189_p3), [#allocation2], %s884_s13 }
  0x39   : > { %1053 = dma.done.wait (%p1156_p6), %s195_s14, 3072  }
  0x3a   : > { %1055 = vsyncadd (%p1156_p6), %s195_s14, 4294964224  ;;  %v1228_v0 = vld [vmem:[%s1221_s20 + $0x60] sm:$0xff]  ;;  %v1231_v1 = vld [vmem:[%s1221_s20 + $0x68] sm:$0xff]  ;;  %v1083_v39 = vmov 0.0|0.0   ;;  %vm1084_vm0 = vmmov 0   ;;  %v1085_v46 = vmov 0.0   ;;  %v321_v49 = vlaneseq }
  0x3b   : > { %v1234_v2 = vld [vmem:[%s1221_s20] sm:$0xff]  ;;  %v273_v3 = vadd.f32 %v1231_v1, %v1228_v0  ;;  %v1239_v4 = vld [vmem:[%s1221_s20 + $0x8] sm:$0xff]  ;;  %v1242_v5 = vld [vmem:[%s1221_s20 + $0x70] sm:$0xff]  ;;  %873 = vmatprep.subr.bf16.mxu0 %v1083_v39  ;;  %865 = vmatprep.mubr.msk.f32.mxu0 %vm1084_vm0, %v1085_v46  ;;  %vm332_vm1 = vcmask 130112   ;;  %vm339_vm2 = vcmask 195712   ;;  %vm346_vm3 = vcmask 261312  }
  0x3c   : > { %v1245_v6 = vld [vmem:[%s1221_s20 + $0x78] sm:$0xff]  ;;  %v255_v7 = vadd.f32 %v1239_v4, %v1234_v2  ;;  %v1250_v8 = vld [vmem:[%s1221_s20 + $0x10] sm:$0xff]  ;;  %v1260_v12 = vld [vmem:[%s1221_s20 + $0x80] sm:$0xff]  ;;  %868 = vmatprep.subr.mxu1 %v1085_v46  ;;  %870 = vmatprep.mubr.msk.f32.mxu1 %vm1084_vm0, %v1085_v46  ;;  %v322_v52 = vand.u32 127, %v321_v49  ;;  %v1341_v54 = vshrl.u32 %v321_v49, 7  ;;  %vm353_vm4 = vcmask 326912  }
  0x3d   : > { %v1253_v9 = vld [vmem:[%s1221_s20 + $0x18] sm:$0xff]  ;;  %274 = vadd.xlane.f32.xlu1 %v273_v3  ;;  %v276_v10 = vadd.f32 %v1245_v6, %v1242_v5  ;;  %v1263_v13 = vld [vmem:[%s1221_s20 + $0x88] sm:$0xff]  ;;  %v1266_v14 = vld [vmem:[%s1221_s20 + $0x20] sm:$0xff]  ;;  %vm360_vm5 = vcmask 392512   ;;  %vm391_vm6 = vcmask 1041409   ;;  %vm393_vm7 = vcmask 392192  }
  0x3e   : > { %256 = vadd.xlane.f32.xlu0 %v255_v7  ;;  %v258_v11 = vadd.f32 %v1253_v9, %v1250_v8  ;;  %v1269_v15 = vld [vmem:[%s1221_s20 + $0x28] sm:$0xff]  ;;  %v279_v16 = vadd.f32 %v1263_v13, %v1260_v12  ;;  %v1276_v18 = vld [vmem:[%s1221_s20 + $0x90] sm:$0xff]  ;;  %v1279_v19 = vld [vmem:[%s1221_s20 + $0x98] sm:$0xff]  ;;  %v327_v55 = vadd.s32 4294967288, %v322_v52  ;;  %v334_v57 = vadd.s32 4294967280, %v322_v52  ;;  %s843_s7 = sshll.u32 %s1138_s19, 5 }
  0x3f   : > { %v261_v17 = vadd.f32 %v1269_v15, %v1266_v14  ;;  %v1282_v20 = vld [vmem:[%s1221_s20 + $0x30] sm:$0xff]  ;;  %v1285_v21 = vld [vmem:[%s1221_s20 + $0x38] sm:$0xff]  ;;  %v282_v22 = vadd.f32 %v1279_v19, %v1276_v18  ;;  %v1292_v24 = vld [vmem:[%s1221_s20 + $0xa0] sm:$0xff]  ;;  %v341_v58 = vadd.s32 4294967272, %v322_v52  ;;  %v348_v60 = vadd.s32 4294967264, %v322_v52  ;;  %s1366_s11 = scalar_lea.hbm %s1504_s4, %s843_s7  ;;  %s688_s23 = scalar_lea.sflag [#allocation7], %s1215_s12 }
  0x40   : > { %v264_v23 = vadd.f32 %v1285_v21, %v1282_v20  ;;  %v1295_v25 = vld [vmem:[%s1221_s20 + $0xa8] sm:$0xff]  ;;  %v1298_v26 = vld [vmem:[%s1221_s20 + $0x40] sm:$0xff]  ;;  %v1308_v30 = vld [vmem:[%s1221_s20 + $0xb0] sm:$0xff]  ;;  %v325_v61 = vsub.s32 %v322_v52, %v1341_v54  ;;  %v330_v62 = vsub.s32 %v327_v55, %v1341_v54  ;;  %vm472_vm8 = vcmask 1042432   ;;  %p1510_p11 = scmp.ne.s32.totalorder %s1507_s26, 0  ;;  %s1087_s29 = smov [#allocation6]  }
  0x41   : > { %277 = vadd.xlane.f32.xlu1 %v276_v10  ;;  %v1301_v27 = vld [vmem:[%s1221_s20 + $0x48] sm:$0xff]  ;;  %v285_v28 = vadd.f32 %v1295_v25, %v1292_v24  ;;  %v1311_v31 = vld [vmem:[%s1221_s20 + $0xb8] sm:$0xff]  ;;  %v1314_v32 = vld [vmem:[%s1221_s20 + $0x50] sm:$0xff]  ;;  %v337_v10 = vsub.s32 %v334_v57, %v1341_v54  ;;  %vm468_vm9 = vcmask 23552   ;;  %vm577_vm10 = vcmask 385024   ;;  %s984_s30 = sshll.u32 %s1087_s29, 4  ;;  %s985_s30 = int_to_ptr.vmem [resolvable:$false] %s984_s30 }
  0x42   : > { %259 = vadd.xlane.f32.xlu0 %v258_v11  ;;  %v267_v29 = vadd.f32 %v1301_v27, %v1298_v26  ;;  %v1317_v33 = vld [vmem:[%s1221_s20 + $0x58] sm:$0xff]  ;;  %v288_v34 = vadd.f32 %v1311_v31, %v1308_v30  ;;  %v303_v36 = vld [vmem:[%s1501_s1] sm:$0xff]  ;;  %v304_v37 = vld [vmem:[%s1501_s1 + $0x8] sm:$0xff]  ;;  %s830_s20 = sshll.u32 %s1215_s12, 1  ;;  %s986_s5 = scalar_lea.vmem %s985_s30, 64 }
  0x43   : > { %v270_v35 = vadd.f32 %v1317_v33, %v1314_v32  ;;  %v874_v38 = vpack.c.bf16 %v304_v37, %v303_v36  ;;  %v305_v40 = vld [vmem:[%s1501_s1 + $0x10] sm:$0xff]  ;;  %v306_v41 = vld [vmem:[%s1501_s1 + $0x18] sm:$0xff]  ;;  %v307_v43 = vld [vmem:[%s1501_s1 + $0x20] sm:$0xff]  ;;  %s227_s25 = scalar_lea.vmem [#allocation6], %s830_s20 }
  0x44   : > { %v877_v42 = vpack.c.bf16 %v306_v41, %v305_v40  ;;  %v308_v44 = vld [vmem:[%s1501_s1 + $0x28] sm:$0xff]  ;;  %s718_s22 = sshll.u32 %s227_s25, 4  ;;  %s1368_s22 = int_to_ptr.vmem [resolvable:$true] %s718_s22 }
  0x45   : > { %280 = vadd.xlane.f32.xlu1 %v279_v16  ;;  %875 = vmatpush3.bf16.msra.mxu0 %v874_v38  ;;  %v880_v45 = vpack.c.bf16 %v308_v44, %v307_v43  ;;  %v344_v16 = vsub.s32 %v341_v58, %v1341_v54  ;;  %s980_s28 = scalar_lea.vmem %s1368_s22, 32  ;;  %p987_p8 = scmp.lt.s32.totalorder %s1368_s22, %s985_s30 }
  0x46   : > { %262 = vadd.xlane.f32.xlu0 %v261_v17  ;;  %876 = vmatprep.subr.bf16.mxu0 %v1083_v39  ;;  %p981_p6 = scmp.ne.s32.totalorder %s1368_s22, %s980_s28  ;;  %p988_p10 = scmp.lt.s32.totalorder %s986_s5, %s980_s28 }
  0x48   : > { %p982_p12 = pnand %p981_p6, %p1510_p11  ;;  %p989_p0 = por %p988_p10, %p987_p8 }
  0x49   : > { %283 = vadd.xlane.f32.xlu1 %v282_v22  ;;  %878 = vmatpush3.bf16.msra.mxu0 %v877_v42 }
  0x4a   : > { %265 = vadd.xlane.f32.xlu0 %v264_v23  ;;  %879 = vmatprep.subr.bf16.mxu0 %v1083_v39  ;;  %p983_p13 = pneg %p982_p12 }
  0x4c   : > { %p990_p2 = pnand %p989_p0, %p983_p13 }
  0x4d   : > { %286 = vadd.xlane.f32.xlu1 %v285_v28  ;;  %881 = vmatpush3.bf16.msra.mxu0 %v880_v45  ;;  %v355_v28 = vadd.s32 4294967256, %v322_v52 }
  0x4e   : > { %268 = vadd.xlane.f32.xlu0 %v267_v29 }
  0x4f   : > { %v358_v46 = vsub.s32 %v355_v28, %v1341_v54 }
  0x51   : > { %289 = vadd.xlane.f32.xlu1 %v288_v34 }
  0x52   : > { %271 = vadd.xlane.f32.xlu0 %v270_v35  ;;  %v351_v35 = vsub.s32 %v348_v60, %v1341_v54 }
  0xca   : > { %v275_v47 = vpop.xlane.xlu1 %274 }
  0xcb   : > { %v257_v48 = vpop.xlane.xlu0 %256  ;;  %v297_v17 = vmul.f32 0.00390625, %v275_v47 }
  0xcc   : > { %v291_v29 = vmul.f32 0.00390625, %v257_v48 }
  0xcd   : > { %v365_v43 = vrot.slane %v297_v17, %v325_v61  ;;  %v467_v17 = vld [vmem:[%s1502_s2] sm:$0x7] }
  0xce   : > { %v278_v50 = vpop.xlane.xlu1 %277  ;;  %v326_v47 = vrot.slane %v291_v29, %v325_v61  ;;  %869 = vmatpush3.msk.msra.mxu1 %vm472_vm8, %v467_v17 }
  0xcf   : > { %v260_v51 = vpop.xlane.xlu0 %259  ;;  %v298_v63 = vmul.f32 0.00390625, %v278_v50 }
  0xd0   : > { %v292_v7 = vmul.f32 0.00390625, %v260_v51 }
  0xd1   : > { %v369_v37 = vrot.slane %v298_v63, %v330_v62 }
  0xd2   : > { %v281_v53 = vpop.xlane.xlu1 %280  ;;  %v331_v40 = vrot.slane %v292_v7, %v330_v62 }
  0xd3   : > { %v263_v56 = vpop.xlane.xlu0 %262  ;;  %v299_v11 = vmul.f32 0.00390625, %v281_v53  ;;  %v370_v51 = vsel %vm332_vm1, %v369_v37, %v365_v43 }
  0xd4   : > { %v293_v22 = vmul.f32 0.00390625, %v263_v56  ;;  %v333_v56 = vsel %vm332_vm1, %v331_v40, %v326_v47 }
  0xd5   : > { %v374_v41 = vrot.slane %v299_v11, %v337_v10 }
  0xd6   : > { %v284_v59 = vpop.xlane.xlu1 %283  ;;  %v338_v44 = vrot.slane %v293_v22, %v337_v10 }
  0xd7   : > { %v266_v3 = vpop.xlane.xlu0 %265  ;;  %v300_v23 = vmul.f32 0.00390625, %v284_v59  ;;  %v375_v57 = vsel %vm339_vm2, %v374_v41, %v370_v51  ;;  %v582_v41 = vsub.s32 0, %v1341_v54 }
  0xd8   : > { %v294_v34 = vmul.f32 0.00390625, %v266_v3  ;;  %v340_v59 = vsel %vm339_vm2, %v338_v44, %v333_v56 }
  0xd9   : > { %v379_v45 = vrot.slane %v300_v23, %v344_v16 }
  0xda   : > { %v287_v36 = vpop.xlane.xlu1 %286  ;;  %v345_v48 = vrot.slane %v294_v34, %v344_v16 }
  0xdb   : > { %v301_v38 = vmul.f32 0.00390625, %v287_v36  ;;  %v269_v39 = vpop.xlane.xlu0 %268  ;;  %v380_v60 = vsel %vm346_vm3, %v379_v45, %v375_v57 }
  0xdc   : > { %v295_v42 = vmul.f32 0.00390625, %v269_v39  ;;  %v347_v62 = vsel %vm346_vm3, %v345_v48, %v340_v59  ;;  %v609_v48 = vsub.s32 1, %v1341_v54 }
  0xdd   : > { %v384_v49 = vrot.slane %v301_v38, %v351_v35  ;;  %v1086_v38 = vmov 1966171168  }
  0xde   : > { %v290_v50 = vpop.xlane.xlu1 %289  ;;  %v352_v52 = vrot.slane %v295_v42, %v351_v35  ;;  %v554_v39 = vunpack.c.l.s4 %v1086_v38 }
  0xdf   : > { %v302_v53 = vmul.f32 0.00390625, %v290_v50  ;;  %v272_v55 = vpop.xlane.xlu0 %271  ;;  %v385_v63 = vsel %vm353_vm4, %v384_v49, %v380_v60 }
  0xe0   : > { %v296_v58 = vmul.f32 0.00390625, %v272_v55  ;;  %v354_v7 = vsel %vm353_vm4, %v352_v52, %v347_v62  ;;  %v555_v40 = vunpack.c.0.s8 %v554_v39 }
  0xe1   : > { %v389_v61 = vrot.slane %v302_v53, %v358_v46 }
  0xe2   : > { %v359_v3 = vrot.slane %v296_v58, %v358_v46  ;;  %v558_v42 = vsub.s32 %v555_v40, %v1341_v54 }
  0xe3   : > { %v390_v10 = vsel %vm360_vm5, %v389_v61, %v385_v63 }
  0xe4   : > { %v361_v11 = vsel %vm360_vm5, %v359_v3, %v354_v7 }
  0xe5   : > { %v392_v16 = vsel %vm391_vm6, %v390_v10, %v361_v11 }
  0xe6   : > { %866 = vmatmul.mubr.msk.f32.vlgmr.msra.gmra.mrb[0].mxu0 %vm393_vm7, %v392_v16 }
 0x1b9   : > { %v462_v22 = vpop.f32.mrb[0].mxu0 }
 0x1ba   : > { %v466_v23 = vmax.f32 %v462_v22, 0.0  ;;  %v867_v28 = vpop.f32.mrb[1].mxu0 }
 0x1bc   : > { %871 = vmatmul.mubr.msk.f32.vlgmr.msra.gmra.mrb[0].mxu1 %vm468_vm9, %v466_v23 }
 0x28f   : > { %v542_v29 = vpop.f32.mrb[0].mxu1 }
 0x290   : > { %v834_v34 = vmul.f32 -1.442695, %v542_v29  ;;  %v872_v35 = vpop.f32.mrb[1].mxu1 }
 0x292   : > { %946 = vpow2.f32 %v834_v34 }
 0x29c   : > { %v947_v36 = vpop.eup %946 }
 0x29d   : > { %v549_v37 = vadd.f32 1.0, %v947_v36 }
 0x29f   : > { %948 = vrcp.f32 %v549_v37 }
 0x2a9   : > { %v949_v43 = vpop.eup %948 }
 0x2aa   : > { %v583_v44 = vrot.slane %v949_v43, %v582_v41  ;;  %v559_v45 = vrot.slane %v949_v43, %v558_v42  ;;  %v610_v50 = vrot.slane %v949_v43, %v609_v48 }
 0x2ac   : > { %589 = vbcast.lane.b32.xlu1 %v583_v44, 264  ;;  %585 = vbcast.lane.b32.xlu0 %v583_v44, 256  ;;  %v560_v46 = vcombine.high %v559_v45, %v559_v45  ;;  %v567_v47 = vrot.slane %v559_v45, %v558_v42 }
 0x2ae   : > { %v574_v49 = vrot.slane %v560_v46, %v558_v42  ;;  %578 = vst.msk [vmem:[%s227_s25] sm:$0x1] %vm577_vm10, %v567_v47 }
 0x2b0   : > { %593 = vbcast.lane.b32.xlu1 %v583_v44, 272  ;;  %601 = vbcast.lane.b32.xlu0 %v583_v44, 288  ;;  %579 = vst.msk [vmem:[%s227_s25 + $0x1] sm:$0x1] %vm577_vm10, %v574_v49 }
 0x2b4   : > { %597 = vbcast.lane.b32.xlu1 %v583_v44, 280  ;;  %612 = vbcast.lane.b32.xlu0 %v610_v50, 256 }
 0x2b8   : > { %605 = vbcast.lane.b32.xlu1 %v583_v44, 296  ;;  %620 = vbcast.lane.b32.xlu0 %v610_v50, 272 }
 0x2bc   : > { %616 = vbcast.lane.b32.xlu1 %v610_v50, 264  ;;  %628 = vbcast.lane.b32.xlu0 %v610_v50, 288 }
 0x2bd   : > { %993 = shalt.err (!%p990_p2)
}
 0x2be   : > { %s994_s6 = scalar_lea.hbm %s1366_s11, 32  ;;  %s998_s20 = scalar_lea.hbm %s1504_s4, 64 }
 0x2bf   : > { %p995_p4 = scmp.ne.s32.totalorder %s1366_s11, %s994_s6  ;;  %p999_p9 = scmp.lt.u32.totalorder %s1366_s11, %s1504_s4 }
 0x2c0   : > { %p1000_p1 = scmp.lt.u32.totalorder %s998_s20, %s994_s6  ;;  %p1002_p6 = scmp.lt.u32.totalorder %s994_s6, %s1366_s11 }
 0x2c1   : > { %p996_p5 = pnand %p995_p4, %p1510_p11 }
 0x2c2   : > { %p1001_p3 = por %p1000_p1, %p999_p9 }
 0x2c3   : > { %p997_p7 = pneg %p996_p5 }
 0x2c4   : > { %p1003_p12 = por %p1002_p6, %p1001_p3 }
 0x2c6   : > { %p1004_p13 = pnand %p1003_p12, %p997_p7 }
 0x2c8   : > { %1007 = shalt.err (!%p1004_p13)
}
 0x2c9   : > { %s1088_s8 = smov 16   ;;  %s1089_s10 = smov 1   ;;  %624 = vbcast.lane.b32.xlu1 %v610_v50, 280 }
 0x2ca   : > { %889 = dma.vmem_to_hbm [thread:$0]  (%p1510_p11), %s1368_s22, 32, %s1366_s11, %s688_s23, %s1088_s8, %s1088_s8, %s1089_s10  }
 0x2cb   : > { %s1402_s28 = scalar_lea.vmem [#allocation5], %s884_s13  ;;  %s885_s13 = smul.u32 3072, %s1138_s19 }
 0x2cc   : > { %s702_s11 = sshll.u32 %s1402_s28, 4  ;;  %s683_s19 = scalar_lea.sflag [#allocation4], %s1215_s12  ;;  %s1453_s11 = int_to_ptr.vmem [resolvable:$true] %s702_s11 }
 0x2cd   : > { %632 = vbcast.lane.b32.xlu1 %v610_v50, 296  ;;  %s1449_s29 = scalar_lea.hbm %s1503_s3, %s885_s13  ;;  %s1008_s30 = scalar_lea.vmem %s1453_s11, 3072 }
 0x2ce   : > { %p1009_p8 = scmp.ne.s32.totalorder %s1453_s11, %s1008_s30  ;;  %s1090_s5 = smov [#allocation5]  }
 0x2cf   : > { %s1012_s6 = sshll.u32 %s1090_s5, 4  ;;  %s1013_s6 = int_to_ptr.vmem [resolvable:$false] %s1012_s6 }
 0x2d0   : > { %p1010_p10 = pnand %p1009_p8, %p1510_p11  ;;  %s1014_s9 = scalar_lea.vmem %s1013_s6, 6144 }
 0x2d1   : > { %p1015_p2 = scmp.lt.s32.totalorder %s1453_s11, %s1013_s6  ;;  %p1016_p4 = scmp.lt.s32.totalorder %s1014_s9, %s1008_s30 }
 0x2d2   : > { %p1011_p0 = pneg %p1010_p10 }
 0x2d3   : > { %p1017_p5 = por %p1016_p4, %p1015_p2 }
 0x2d5   : > { %p1018_p7 = pnand %p1017_p5, %p1011_p0 }
 0x31e   : > { %v590_v54 = vpop.permute.xlu1 %589  ;;  %v586_v51 = vpop.permute.xlu0 %585 }
 0x31f   : > { %v636_v52 = vmul.f32 %v590_v54, %v1250_v8  ;;  %v637_v53 = vmul.f32 %v590_v54, %v1253_v9  ;;  %v634_v55 = vmul.f32 %v586_v51, %v1234_v2  ;;  %v635_v56 = vmul.f32 %v586_v51, %v1239_v4 }
 0x321   : > { %660 = vst [vmem:[%s1402_s28 + $0x10] sm:$0xff] %v636_v52  ;;  %661 = vst [vmem:[%s1402_s28 + $0x18] sm:$0xff] %v637_v53 }
 0x322   : > { %658 = vst [vmem:[%s1402_s28] sm:$0xff] %v634_v55  ;;  %659 = vst [vmem:[%s1402_s28 + $0x8] sm:$0xff] %v635_v56  ;;  %v594_v8 = vpop.permute.xlu1 %593  ;;  %v602_v2 = vpop.permute.xlu0 %601 }
 0x323   : > { %v638_v4 = vmul.f32 %v594_v8, %v1266_v14  ;;  %v639_v9 = vmul.f32 %v594_v8, %v1269_v15  ;;  %v642_v57 = vmul.f32 %v602_v2, %v1298_v26  ;;  %v643_v58 = vmul.f32 %v602_v2, %v1301_v27 }
 0x325   : > { %662 = vst [vmem:[%s1402_s28 + $0x20] sm:$0xff] %v638_v4  ;;  %663 = vst [vmem:[%s1402_s28 + $0x28] sm:$0xff] %v639_v9 }
 0x326   : > { %666 = vst [vmem:[%s1402_s28 + $0x40] sm:$0xff] %v642_v57  ;;  %667 = vst [vmem:[%s1402_s28 + $0x48] sm:$0xff] %v643_v58  ;;  %v598_v59 = vpop.permute.xlu1 %597  ;;  %v613_v60 = vpop.permute.xlu0 %612 }
 0x327   : > { %v640_v61 = vmul.f32 %v598_v59, %v1282_v20  ;;  %v641_v14 = vmul.f32 %v598_v59, %v1285_v21  ;;  %v646_v15 = vmul.f32 %v613_v60, %v1228_v0  ;;  %v647_v26 = vmul.f32 %v613_v60, %v1231_v1 }
 0x329   : > { %664 = vst [vmem:[%s1402_s28 + $0x30] sm:$0xff] %v640_v61  ;;  %665 = vst [vmem:[%s1402_s28 + $0x38] sm:$0xff] %v641_v14 }
 0x32a   : > { %670 = vst [vmem:[%s1402_s28 + $0x60] sm:$0xff] %v646_v15  ;;  %671 = vst [vmem:[%s1402_s28 + $0x68] sm:$0xff] %v647_v26  ;;  %v606_v27 = vpop.permute.xlu1 %605  ;;  %v621_v62 = vpop.permute.xlu0 %620 }
 0x32b   : > { %v644_v63 = vmul.f32 %v606_v27, %v1314_v32  ;;  %v645_v20 = vmul.f32 %v606_v27, %v1317_v33  ;;  %v650_v21 = vmul.f32 %v621_v62, %v1260_v12  ;;  %v651_v0 = vmul.f32 %v621_v62, %v1263_v13 }
 0x32d   : > { %668 = vst [vmem:[%s1402_s28 + $0x50] sm:$0xff] %v644_v63  ;;  %669 = vst [vmem:[%s1402_s28 + $0x58] sm:$0xff] %v645_v20 }
 0x32e   : > { %674 = vst [vmem:[%s1402_s28 + $0x80] sm:$0xff] %v650_v21  ;;  %675 = vst [vmem:[%s1402_s28 + $0x88] sm:$0xff] %v651_v0  ;;  %v617_v1 = vpop.permute.xlu1 %616  ;;  %v629_v3 = vpop.permute.xlu0 %628 }
 0x32f   : > { %v648_v32 = vmul.f32 %v617_v1, %v1242_v5  ;;  %v649_v7 = vmul.f32 %v617_v1, %v1245_v6  ;;  %v654_v33 = vmul.f32 %v629_v3, %v1292_v24  ;;  %v655_v12 = vmul.f32 %v629_v3, %v1295_v25 }
 0x331   : > { %672 = vst [vmem:[%s1402_s28 + $0x70] sm:$0xff] %v648_v32  ;;  %673 = vst [vmem:[%s1402_s28 + $0x78] sm:$0xff] %v649_v7 }
 0x332   : > { %678 = vst [vmem:[%s1402_s28 + $0xa0] sm:$0xff] %v654_v33  ;;  %679 = vst [vmem:[%s1402_s28 + $0xa8] sm:$0xff] %v655_v12 }
 0x33b   : > { %v625_v13 = vpop.permute.xlu1 %624 }
 0x33c   : > { %v652_v10 = vmul.f32 %v625_v13, %v1276_v18  ;;  %v653_v5 = vmul.f32 %v625_v13, %v1279_v19 }
 0x33e   : > { %676 = vst [vmem:[%s1402_s28 + $0x90] sm:$0xff] %v652_v10  ;;  %677 = vst [vmem:[%s1402_s28 + $0x98] sm:$0xff] %v653_v5 }
 0x33f   : > { %v633_v6 = vpop.permute.xlu1 %632 }
 0x340   : > { %v656_v24 = vmul.f32 %v633_v6, %v1308_v30  ;;  %v657_v25 = vmul.f32 %v633_v6, %v1311_v31 }
 0x342   : > { %680 = vst [vmem:[%s1402_s28 + $0xb0] sm:$0xff] %v656_v24  ;;  %681 = vst [vmem:[%s1402_s28 + $0xb8] sm:$0xff] %v657_v25 }
 0x343   : > { %1021 = shalt.err (!%p1018_p7)
}
 0x344   : > { %s1022_s14 = scalar_lea.hbm %s1449_s29, 3072  ;;  %s1026_s7 = scalar_lea.hbm %s1503_s3, 6144 }
 0x345   : > { %p1023_p9 = scmp.ne.s32.totalorder %s1449_s29, %s1022_s14  ;;  %p1027_p6 = scmp.lt.u32.totalorder %s1449_s29, %s1503_s3 }
 0x346   : > { %p1028_p12 = scmp.lt.u32.totalorder %s1026_s7, %s1022_s14  ;;  %p1030_p8 = scmp.lt.u32.totalorder %s1022_s14, %s1449_s29 }
 0x347   : > { %p1024_p1 = pnand %p1023_p9, %p1510_p11 }
 0x348   : > { %p1029_p13 = por %p1028_p12, %p1027_p6 }
 0x349   : > { %p1025_p3 = pneg %p1024_p1 }
 0x34a   : > { %p1031_p10 = por %p1030_p8, %p1029_p13 }
 0x34c   : > { %p1032_p0 = pnand %p1031_p10, %p1025_p3 }
 0x34e   : > { %1035 = shalt.err (!%p1032_p0)
}
 0x34f   : > { %s1091_s13 = smov 256  }
 0x350   : > { %888 = dma.vmem_to_hbm [thread:$0]  (%p1510_p11), %s1453_s11, 3072, %s1449_s29, %s683_s19, %s1091_s13, %s1091_s13, %s1088_s8  }
 0x351 PF: > { %s733_s22 = sand.u32 1, %s1066_s15   ;;  %p1511_p2 = scmp.ne.s32.totalorder %s1508_s27, 0 }
 0x352   : > { %p1512_p4 = scmp.ge.s32.totalorder %s1078_s18, 2  ;;  %s734_s23 = scalar_lea.sflag [#allocation4], %s733_s22 }
 0x354   : > { %p897_p5 = pnand %p1512_p4, %p1511_p2 }
 0x356   : > { %1057 = dma.done.wait (!%p897_p5), %s734_s23, 3072  }
 0x357   : > { %1059 = vsyncadd (!%p897_p5), %s734_s23, 4294964224  ;;  %s743_s30 = scalar_lea.sflag [#allocation7], %s733_s22 }
 0x358   : > { %1061 = dma.done.wait (!%p897_p5), %s743_s30, 32  }
 0x359   : > { %1063 = vsyncadd (!%p897_p5), %s743_s30, 4294967264  ;;  %p21_p11 = scmp.ge.s32.totalorder %s1142_s21, 4   ;;  %s1513_s15 = smov %s1070_s16 }
 0x35a   : > { %s1514_s16 = smov %s1074_s17  ;;  %s1515_s17 = smov %s1154_s24 }
 0x35b   : > { %s1516_s18 = smov %s1142_s21  ;;  %23 = sbr.rel (!%p21_p11) target bundleno = 7 (0x7), region = 94 }
 0x362   :  { %748 = vsyncpa [#allocation3], 1 }
 0x363   :  { %750 = vsyncpa [#allocation3 + $0x1], 1 }
 0x364   :  { %751 = vsyncpa [#allocation4], 1 }
 0x365   :  { %753 = vsyncpa [#allocation4 + $0x1], 1 }
 0x366   :  { %754 = vsyncpa [#allocation7], 1 }
 0x367   :  { %756 = vsyncpa [#allocation7 + $0x1], 1 }

</bundles_post_ra>
